<compile_context>
chip_gen: v6e
topology: v6e:2x2x1
jax: 0.10.0
libtpu: 0.0.40
codegen_flags: <defaults>
</compile_context>

<pallas_src>
import functools

import jax
import jax.numpy as jnp
import numpy as np
from jax import lax
from jax.experimental import pallas as pl
from jax.experimental.pallas import tpu as pltpu


def _leaky(v):
    # F.leaky_relu(v, 0.2)
    return jnp.where(v > 0, v, 0.2 * v)


def resnet_block_kernel(*refs, H, W, fin, fhidden, fout, learned_shortcut,
                        p_alloc):
    if learned_shortcut:
        (x_ref, w0_ref, b0_ref, w1_ref, b1_ref, ws_ref,
         o_ref, pad_ref, col_ref) = refs
    else:
        (x_ref, w0_ref, b0_ref, w1_ref, b1_ref,
         o_ref, pad_ref, col_ref) = refs
        ws_ref = None

    HW = H * W
    base = W + 1                     # lane offset of pixel (0,0) in pad scratch
    cmax = pad_ref.shape[0]

    # Zero only the halo columns; the interior [base, base+HW) is fully
    # overwritten by every conv before it is read.
    pad_ref[:, 0:base] = jnp.zeros((cmax, base), jnp.float32)
    pad_ref[:, base + HW:p_alloc] = jnp.zeros((cmax, p_alloc - base - HW),
                                              jnp.float32)

    x = x_ref[0]                     # (fin, HW), f32

    # Hoisted W-boundary masks (indexed by the *output* pixel's column j).
    j_idx = lax.broadcasted_iota(jnp.int32, (1, HW), 1) % W
    ok_m1 = j_idx >= 1               # left  neighbour (kx = -1) is valid
    ok_p1 = j_idx <= (W - 2)         # right neighbour (kx = +1) is valid

    def conv3x3(h, w2d_ref, cin):
        # place activation in the lane-padded scratch interior
        pad_ref[0:cin, base:base + HW] = h
        # build (9*cin, HW) im2col matrix from 9 shifted lane windows
        tap = 0
        for ky in (-1, 0, 1):
            for kx in (-1, 0, 1):
                start = base + ky * W + kx          # static python int, >= 0
                p = pad_ref[0:cin, start:start + HW]
                if kx == -1:
                    p = jnp.where(ok_m1, p, 0.0)
                elif kx == 1:
                    p = jnp.where(ok_p1, p, 0.0)
                col_ref[tap * cin:(tap + 1) * cin, :] = p
                tap += 1
        col = col_ref[0:9 * cin, :]                 # (9*cin, HW)
        # single MXU matmul: (cout, 9*cin) @ (9*cin, HW) -> (cout, HW)
        return jnp.dot(w2d_ref[...], col, preferred_element_type=jnp.float32)

    # ---- shortcut ----
    if learned_shortcut:
        x_s = jnp.dot(ws_ref[...], x, preferred_element_type=jnp.float32)
    else:
        x_s = x

    # ---- dx = conv_1(actvn(conv_0(actvn(x)))) ----
    dx0 = conv3x3(_leaky(x), w0_ref, fin) + b0_ref[...]
    dx1 = conv3x3(_leaky(dx0), w1_ref, fhidden) + b1_ref[...]

    o_ref[0] = (x_s + 0.1 * dx1).astype(o_ref.dtype)


def resnet_block_pallas(x_nchw, params, *, fin, fout, fhidden):
    """x_nchw: (B, fin, H, W) float32. Returns (B, fout, H, W)."""
    B, C, H, W = x_nchw.shape
    assert C == fin
    learned_shortcut = fin != fout
    w0, b0, w1, b1, ws = params      # w in (KH, KW, Cin, Cout), ws in (Cin, Cout)

    HW = H * W
    # NCHW -> (B, C, H*W): channels on sublanes, flattened spatial on lanes.
    x_flat = x_nchw.reshape(B, fin, HW).astype(jnp.float32)

    # weights -> im2col layout (Cout, 9*Cin), tap-major (ky, kx), cin minor
    w0_2d = jnp.transpose(w0, (3, 0, 1, 2)).reshape(fhidden, 9 * fin)
    w1_2d = jnp.transpose(w1, (3, 0, 1, 2)).reshape(fout, 9 * fhidden)
    b0_col = b0.reshape(fhidden, 1)
    b1_col = b1.reshape(fout, 1)

    cmax = max(fin, fhidden)
    p_alloc = ((HW + 2 * W + 2 + 127) // 128) * 128   # lane-padded scratch len

    kernel = functools.partial(
        resnet_block_kernel, H=H, W=W, fin=fin, fhidden=fhidden, fout=fout,
        learned_shortcut=learned_shortcut, p_alloc=p_alloc)

    in_specs = [
        pl.BlockSpec((1, fin, HW), lambda b: (b, 0, 0)),
        pl.BlockSpec((fhidden, 9 * fin), lambda b: (0, 0)),
        pl.BlockSpec((fhidden, 1), lambda b: (0, 0)),
        pl.BlockSpec((fout, 9 * fhidden), lambda b: (0, 0)),
        pl.BlockSpec((fout, 1), lambda b: (0, 0)),
    ]
    args = [x_flat, w0_2d, b0_col, w1_2d, b1_col]
    if learned_shortcut:
        in_specs.append(pl.BlockSpec((fout, fin), lambda b: (0, 0)))
        args.append(jnp.transpose(ws, (1, 0)))      # (fout, fin)

    out_flat = pl.pallas_call(
        kernel,
        out_shape=jax.ShapeDtypeStruct((B, fout, HW), jnp.float32),
        grid_spec=pltpu.PrefetchScalarGridSpec(
            num_scalar_prefetch=0,
            grid=(B,),
            in_specs=in_specs,
            out_specs=pl.BlockSpec((1, fout, HW), lambda b: (b, 0, 0)),
            scratch_shapes=[
                pltpu.VMEM((cmax, p_alloc), jnp.float32),       # halo-padded act
                pltpu.VMEM((9 * cmax, HW), jnp.float32),        # im2col columns
            ],
        ),
        compiler_params=pltpu.CompilerParams(
            dimension_semantics=("parallel",)),     # v7x: shard batch over TCs
    )(*args)

    return out_flat.reshape(B, fout, H, W)


def resnet_block_ref(x_nchw, params, *, fin, fout):
    """Pure-JAX NCHW reference (mirrors the PyTorch module)."""
    w0, b0, w1, b1, ws = params      # weights in (KH, KW, Cin, Cout)

    def conv(x, w_hwio, b, pad):
        w_oihw = jnp.transpose(w_hwio, (3, 2, 0, 1))
        y = lax.conv_general_dilated(
            x, w_oihw, window_strides=(1, 1),
            padding=[(pad, pad), (pad, pad)],
            dimension_numbers=('NCHW', 'OIHW', 'NCHW'))
        if b is not None:
            y = y + b.reshape(1, -1, 1, 1)
        return y

    if fin != fout:
        x_s = conv(x_nchw, ws.reshape(1, 1, fin, fout), None, 0)
    else:
        x_s = x_nchw
    dx = conv(_leaky(x_nchw), w0, b0.reshape(-1), 1)
    dx = conv(_leaky(dx), w1, b1.reshape(-1), 1)
    return x_s + 0.1 * dx


def _make_params(key, fin, fout, fhidden):
    ks = jax.random.split(key, 5)
    w0 = jax.random.normal(ks[0], (3, 3, fin, fhidden), jnp.float32) * 0.1
    b0 = jax.random.normal(ks[1], (1, fhidden), jnp.float32) * 0.1
    w1 = jax.random.normal(ks[2], (3, 3, fhidden, fout), jnp.float32) * 0.1
    b1 = jax.random.normal(ks[3], (1, fout), jnp.float32) * 0.1
    ws = jax.random.normal(ks[4], (fin, fout), jnp.float32) * 0.1
    return (w0, b0, w1, b1, ws)


if __name__ == "__main__":
    key = jax.random.PRNGKey(0)
    kx, kp = jax.random.split(key, 2)

    B, H, W = 2, 16, 16
    # (fin != fout) exercises the learned 1x1 shortcut; (fin == fout) the
    # identity-shortcut variant with no ws input at all.
    for fin, fout in [(4, 8), (8, 8)]:
        fhidden = min(fin, fout)     # ResnetBlock default fhidden
        x = jax.random.normal(kx, (B, fin, H, W), jnp.float32)
        params = _make_params(kp, fin, fout, fhidden)

        out = resnet_block_pallas(x, params, fin=fin, fout=fout,
                                  fhidden=fhidden)
        out = jax.block_until_ready(out)

        ref = resnet_block_ref(x, params, fin=fin, fout=fout)
        np.testing.assert_allclose(np.asarray(out), np.asarray(ref),
                                   rtol=2e-4, atol=2e-4)

    print("KERNEL_OK")
</pallas_src>

<mosaic_0001>
module attributes {stable_mosaic.version = 11 : i64} {
  func.func @resnet_block_kernel(%arg0: i32, %arg1: memref<1x4x256xf32, #tpu.memory_space<vmem>>, %arg2: memref<4x36xf32, #tpu.memory_space<vmem>>, %arg3: memref<4x1xf32, #tpu.memory_space<vmem>>, %arg4: memref<8x36xf32, #tpu.memory_space<vmem>>, %arg5: memref<8x1xf32, #tpu.memory_space<vmem>>, %arg6: memref<8x4xf32, #tpu.memory_space<vmem>>, %arg7: memref<1x8x256xf32, #tpu.memory_space<vmem>>, %arg8: memref<4x384xf32, #tpu.memory_space<vmem>>, %arg9: memref<36x256xf32, #tpu.memory_space<vmem>>) attributes {dimension_semantics = [#tpu.dimension_semantics<parallel>], iteration_bounds = array<i64: 2>, scalar_prefetch = 0 : i64, scratch_operands = 2 : i64, tpu.core_type = #tpu.core_type<tc>, window_params = [{transform_indices = @transform_0, window_bounds = array<i64: 1, 4, 256>}, {pipeline_mode = #tpu.pipeline_mode<synchronous>, transform_indices = @transform_1, window_bounds = array<i64: 4, 36>}, {pipeline_mode = #tpu.pipeline_mode<synchronous>, transform_indices = @transform_2, window_bounds = array<i64: 4, 1>}, {pipeline_mode = #tpu.pipeline_mode<synchronous>, transform_indices = @transform_3, window_bounds = array<i64: 8, 36>}, {pipeline_mode = #tpu.pipeline_mode<synchronous>, transform_indices = @transform_4, window_bounds = array<i64: 8, 1>}, {pipeline_mode = #tpu.pipeline_mode<synchronous>, transform_indices = @transform_5, window_bounds = array<i64: 8, 4>}, {transform_indices = @transform_6, window_bounds = array<i64: 1, 8, 256>}]} {
    %cst = arith.constant 0.000000e+00 : f32
    %0 = vector.broadcast %cst : f32 to vector<4x17xf32>
    %c0 = arith.constant 0 : index
    %c0_0 = arith.constant 0 : index
    %1 = vector.load %arg8[%c0, %c0_0] : memref<4x384xf32, #tpu.memory_space<vmem>>, vector<4x17xf32>
    tpu.vector_store %arg8[%c0, %c0_0], %0 {strides = array<i32>} : memref<4x384xf32, #tpu.memory_space<vmem>>, vector<4x17xf32>,
    %cst_1 = arith.constant 0.000000e+00 : f32
    %2 = vector.broadcast %cst_1 : f32 to vector<4x111xf32>
    %c0_2 = arith.constant 0 : index
    %c273 = arith.constant 273 : index
    %3 = vector.load %arg8[%c0_2, %c273] : memref<4x384xf32, #tpu.memory_space<vmem>>, vector<4x111xf32>
    tpu.vector_store %arg8[%c0_2, %c273], %2 {strides = array<i32>} : memref<4x384xf32, #tpu.memory_space<vmem>>, vector<4x111xf32>,
    %c0_3 = arith.constant 0 : index
    %c0_4 = arith.constant 0 : index
    %c0_5 = arith.constant 0 : index
    %4 = vector.load %arg1[%c0_3, %c0_4, %c0_5] : memref<1x4x256xf32, #tpu.memory_space<vmem>>, vector<1x4x256xf32>
    %5 = vector.shape_cast %4 : vector<1x4x256xf32> to vector<4x256xf32>
    %6 = tpu.iota {dimensions = array<i32: 1>} : vector<1x256xi32>
    %c16_i32 = arith.constant 16 : i32
    %c0_i32 = arith.constant 0 : i32
    %7 = arith.cmpi eq, %c16_i32, %c0_i32 : i32
    %c1_i32 = arith.constant 1 : i32
    %8 = arith.select %7, %c1_i32, %c16_i32 : i32
    %9 = vector.broadcast %8 : i32 to vector<1x256xi32>
    %10 = arith.remsi %6, %9 : vector<1x256xi32>
    %c0_i32_6 = arith.constant 0 : i32
    %11 = vector.broadcast %c0_i32_6 : i32 to vector<1x256xi32>
    %12 = arith.cmpi ne, %10, %11 : vector<1x256xi32>
    %c0_i32_7 = arith.constant 0 : i32
    %13 = vector.broadcast %c0_i32_7 : i32 to vector<1x256xi32>
    %14 = arith.cmpi slt, %10, %13 : vector<1x256xi32>
    %c0_i32_8 = arith.constant 0 : i32
    %15 = arith.cmpi slt, %8, %c0_i32_8 : i32
    %16 = vector.broadcast %15 : i1 to vector<1x256xi1>
    %17 = vector.broadcast %16 : vector<1x256xi1> to vector<1x256xi1>
    %18 = arith.xori %14, %17 : vector<1x256xi1>
    %19 = arith.andi %18, %12 : vector<1x256xi1>
    %20 = vector.broadcast %8 : i32 to vector<1x256xi32>
    %21 = arith.addi %10, %20 : vector<1x256xi32>
    %22 = arith.select %19, %21, %10 : vector<1x256xi1>, vector<1x256xi32>
    %c1_i32_9 = arith.constant 1 : i32
    %23 = vector.broadcast %c1_i32_9 : i32 to vector<1x256xi32>
    %24 = arith.cmpi sge, %22, %23 : vector<1x256xi32>
    %c14_i32 = arith.constant 14 : i32
    %25 = vector.broadcast %c14_i32 : i32 to vector<1x256xi32>
    %26 = arith.cmpi sle, %22, %25 : vector<1x256xi32>
    %c0_10 = arith.constant 0 : index
    %c0_11 = arith.constant 0 : index
    %27 = vector.load %arg6[%c0_10, %c0_11] : memref<8x4xf32, #tpu.memory_space<vmem>>, vector<8x4xf32>
    %cst_12 = arith.constant dense<0.000000e+00> : vector<8x256xf32>
    %28 = tpu.matmul %27, %5, %cst_12 {dimension_numbers = #tpu.dot_dimension_numbers<[1], [0], [0], [1], [0, 0, 1, 1], [], []>} : vector<8x4xf32>, vector<4x256xf32>, vector<8x256xf32> -> vector<8x256xf32>
    %cst_13 = arith.constant 0.000000e+00 : f32
    %29 = vector.broadcast %cst_13 : f32 to vector<4x256xf32>
    %30 = arith.cmpf ogt, %5, %29 : vector<4x256xf32>
    %cst_14 = arith.constant 2.000000e-01 : f32
    %31 = vector.broadcast %cst_14 : f32 to vector<4x256xf32>
    %32 = arith.mulf %31, %5 : vector<4x256xf32>
    %33 = arith.select %30, %5, %32 : vector<4x256xi1>, vector<4x256xf32>
    %c0_15 = arith.constant 0 : index
    %c17 = arith.constant 17 : index
    %34 = vector.load %arg8[%c0_15, %c17] : memref<4x384xf32, #tpu.memory_space<vmem>>, vector<4x256xf32>
    tpu.vector_store %arg8[%c0_15, %c17], %33 {strides = array<i32>} : memref<4x384xf32, #tpu.memory_space<vmem>>, vector<4x256xf32>,
    %c0_16 = arith.constant 0 : index
    %c0_17 = arith.constant 0 : index
    %35 = vector.load %arg8[%c0_16, %c0_17] : memref<4x384xf32, #tpu.memory_space<vmem>>, vector<4x256xf32>
    %cst_18 = arith.constant 0.000000e+00 : f32
    %36 = vector.shape_cast %24 : vector<1x256xi1> to vector<1x256xi1>
    %37 = vector.broadcast %36 : vector<1x256xi1> to vector<4x256xi1>
    %38 = vector.broadcast %cst_18 : f32 to vector<4x256xf32>
    %39 = arith.select %37, %35, %38 : vector<4x256xi1>, vector<4x256xf32>
    %c0_19 = arith.constant 0 : index
    %c0_20 = arith.constant 0 : index
    %40 = vector.load %arg9[%c0_19, %c0_20] : memref<36x256xf32, #tpu.memory_space<vmem>>, vector<4x256xf32>
    tpu.vector_store %arg9[%c0_19, %c0_20], %39 {strides = array<i32>} : memref<36x256xf32, #tpu.memory_space<vmem>>, vector<4x256xf32>,
    %c0_21 = arith.constant 0 : index
    %c1 = arith.constant 1 : index
    %41 = vector.load %arg8[%c0_21, %c1] : memref<4x384xf32, #tpu.memory_space<vmem>>, vector<4x256xf32>
    %c4 = arith.constant 4 : index
    %c0_22 = arith.constant 0 : index
    %42 = vector.load %arg9[%c4, %c0_22] : memref<36x256xf32, #tpu.memory_space<vmem>>, vector<4x256xf32>
    tpu.vector_store %arg9[%c4, %c0_22], %41 {strides = array<i32>} : memref<36x256xf32, #tpu.memory_space<vmem>>, vector<4x256xf32>,
    %c0_23 = arith.constant 0 : index
    %c2 = arith.constant 2 : index
    %43 = vector.load %arg8[%c0_23, %c2] : memref<4x384xf32, #tpu.memory_space<vmem>>, vector<4x256xf32>
    %cst_24 = arith.constant 0.000000e+00 : f32
    %44 = vector.shape_cast %26 : vector<1x256xi1> to vector<1x256xi1>
    %45 = vector.broadcast %44 : vector<1x256xi1> to vector<4x256xi1>
    %46 = vector.broadcast %cst_24 : f32 to vector<4x256xf32>
    %47 = arith.select %45, %43, %46 : vector<4x256xi1>, vector<4x256xf32>
    %c8 = arith.constant 8 : index
    %c0_25 = arith.constant 0 : index
    %48 = vector.load %arg9[%c8, %c0_25] : memref<36x256xf32, #tpu.memory_space<vmem>>, vector<4x256xf32>
    tpu.vector_store %arg9[%c8, %c0_25], %47 {strides = array<i32>} : memref<36x256xf32, #tpu.memory_space<vmem>>, vector<4x256xf32>,
    %c0_26 = arith.constant 0 : index
    %c16 = arith.constant 16 : index
    %49 = vector.load %arg8[%c0_26, %c16] : memref<4x384xf32, #tpu.memory_space<vmem>>, vector<4x256xf32>
    %cst_27 = arith.constant 0.000000e+00 : f32
    %50 = vector.shape_cast %24 : vector<1x256xi1> to vector<1x256xi1>
    %51 = vector.broadcast %50 : vector<1x256xi1> to vector<4x256xi1>
    %52 = vector.broadcast %cst_27 : f32 to vector<4x256xf32>
    %53 = arith.select %51, %49, %52 : vector<4x256xi1>, vector<4x256xf32>
    %c12 = arith.constant 12 : index
    %c0_28 = arith.constant 0 : index
    %54 = vector.load %arg9[%c12, %c0_28] : memref<36x256xf32, #tpu.memory_space<vmem>>, vector<4x256xf32>
    tpu.vector_store %arg9[%c12, %c0_28], %53 {strides = array<i32>} : memref<36x256xf32, #tpu.memory_space<vmem>>, vector<4x256xf32>,
    %c0_29 = arith.constant 0 : index
    %c17_30 = arith.constant 17 : index
    %55 = vector.load %arg8[%c0_29, %c17_30] : memref<4x384xf32, #tpu.memory_space<vmem>>, vector<4x256xf32>
    %c16_31 = arith.constant 16 : index
    %c0_32 = arith.constant 0 : index
    %56 = vector.load %arg9[%c16_31, %c0_32] : memref<36x256xf32, #tpu.memory_space<vmem>>, vector<4x256xf32>
    tpu.vector_store %arg9[%c16_31, %c0_32], %55 {strides = array<i32>} : memref<36x256xf32, #tpu.memory_space<vmem>>, vector<4x256xf32>,
    %c0_33 = arith.constant 0 : index
    %c18 = arith.constant 18 : index
    %57 = vector.load %arg8[%c0_33, %c18] : memref<4x384xf32, #tpu.memory_space<vmem>>, vector<4x256xf32>
    %cst_34 = arith.constant 0.000000e+00 : f32
    %58 = vector.shape_cast %26 : vector<1x256xi1> to vector<1x256xi1>
    %59 = vector.broadcast %58 : vector<1x256xi1> to vector<4x256xi1>
    %60 = vector.broadcast %cst_34 : f32 to vector<4x256xf32>
    %61 = arith.select %59, %57, %60 : vector<4x256xi1>, vector<4x256xf32>
    %c20 = arith.constant 20 : index
    %c0_35 = arith.constant 0 : index
    %62 = vector.load %arg9[%c20, %c0_35] : memref<36x256xf32, #tpu.memory_space<vmem>>, vector<4x256xf32>
    tpu.vector_store %arg9[%c20, %c0_35], %61 {strides = array<i32>} : memref<36x256xf32, #tpu.memory_space<vmem>>, vector<4x256xf32>,
    %c0_36 = arith.constant 0 : index
    %c32 = arith.constant 32 : index
    %63 = vector.load %arg8[%c0_36, %c32] : memref<4x384xf32, #tpu.memory_space<vmem>>, vector<4x256xf32>
    %cst_37 = arith.constant 0.000000e+00 : f32
    %64 = vector.shape_cast %24 : vector<1x256xi1> to vector<1x256xi1>
    %65 = vector.broadcast %64 : vector<1x256xi1> to vector<4x256xi1>
    %66 = vector.broadcast %cst_37 : f32 to vector<4x256xf32>
    %67 = arith.select %65, %63, %66 : vector<4x256xi1>, vector<4x256xf32>
    %c24 = arith.constant 24 : index
    %c0_38 = arith.constant 0 : index
    %68 = vector.load %arg9[%c24, %c0_38] : memref<36x256xf32, #tpu.memory_space<vmem>>, vector<4x256xf32>
    tpu.vector_store %arg9[%c24, %c0_38], %67 {strides = array<i32>} : memref<36x256xf32, #tpu.memory_space<vmem>>, vector<4x256xf32>,
    %c0_39 = arith.constant 0 : index
    %c33 = arith.constant 33 : index
    %69 = vector.load %arg8[%c0_39, %c33] : memref<4x384xf32, #tpu.memory_space<vmem>>, vector<4x256xf32>
    %c28 = arith.constant 28 : index
    %c0_40 = arith.constant 0 : index
    %70 = vector.load %arg9[%c28, %c0_40] : memref<36x256xf32, #tpu.memory_space<vmem>>, vector<4x256xf32>
    tpu.vector_store %arg9[%c28, %c0_40], %69 {strides = array<i32>} : memref<36x256xf32, #tpu.memory_space<vmem>>, vector<4x256xf32>,
    %c0_41 = arith.constant 0 : index
    %c34 = arith.constant 34 : index
    %71 = vector.load %arg8[%c0_41, %c34] : memref<4x384xf32, #tpu.memory_space<vmem>>, vector<4x256xf32>
    %cst_42 = arith.constant 0.000000e+00 : f32
    %72 = vector.shape_cast %26 : vector<1x256xi1> to vector<1x256xi1>
    %73 = vector.broadcast %72 : vector<1x256xi1> to vector<4x256xi1>
    %74 = vector.broadcast %cst_42 : f32 to vector<4x256xf32>
    %75 = arith.select %73, %71, %74 : vector<4x256xi1>, vector<4x256xf32>
    %c32_43 = arith.constant 32 : index
    %c0_44 = arith.constant 0 : index
    %76 = vector.load %arg9[%c32_43, %c0_44] : memref<36x256xf32, #tpu.memory_space<vmem>>, vector<4x256xf32>
    tpu.vector_store %arg9[%c32_43, %c0_44], %75 {strides = array<i32>} : memref<36x256xf32, #tpu.memory_space<vmem>>, vector<4x256xf32>,
    %c0_45 = arith.constant 0 : index
    %c0_46 = arith.constant 0 : index
    %77 = vector.load %arg9[%c0_45, %c0_46] : memref<36x256xf32, #tpu.memory_space<vmem>>, vector<36x256xf32>
    %c0_47 = arith.constant 0 : index
    %c0_48 = arith.constant 0 : index
    %78 = vector.load %arg2[%c0_47, %c0_48] : memref<4x36xf32, #tpu.memory_space<vmem>>, vector<4x36xf32>
    %cst_49 = arith.constant dense<0.000000e+00> : vector<4x256xf32>
    %79 = tpu.matmul %78, %77, %cst_49 {dimension_numbers = #tpu.dot_dimension_numbers<[1], [0], [0], [1], [0, 0, 1, 1], [], []>} : vector<4x36xf32>, vector<36x256xf32>, vector<4x256xf32> -> vector<4x256xf32>
    %c0_50 = arith.constant 0 : index
    %c0_51 = arith.constant 0 : index
    %80 = vector.load %arg3[%c0_50, %c0_51] : memref<4x1xf32, #tpu.memory_space<vmem>>, vector<4x1xf32>
    %81 = vector.broadcast %80 : vector<4x1xf32> to vector<4x256xf32>
    %82 = arith.addf %79, %81 : vector<4x256xf32>
    %cst_52 = arith.constant 0.000000e+00 : f32
    %83 = vector.broadcast %cst_52 : f32 to vector<4x256xf32>
    %84 = arith.cmpf ogt, %82, %83 : vector<4x256xf32>
    %cst_53 = arith.constant 2.000000e-01 : f32
    %85 = vector.broadcast %cst_53 : f32 to vector<4x256xf32>
    %86 = arith.mulf %85, %82 : vector<4x256xf32>
    %87 = arith.select %84, %82, %86 : vector<4x256xi1>, vector<4x256xf32>
    %c0_54 = arith.constant 0 : index
    %c17_55 = arith.constant 17 : index
    %88 = vector.load %arg8[%c0_54, %c17_55] : memref<4x384xf32, #tpu.memory_space<vmem>>, vector<4x256xf32>
    tpu.vector_store %arg8[%c0_54, %c17_55], %87 {strides = array<i32>} : memref<4x384xf32, #tpu.memory_space<vmem>>, vector<4x256xf32>,
    %c0_56 = arith.constant 0 : index
    %c0_57 = arith.constant 0 : index
    %89 = vector.load %arg8[%c0_56, %c0_57] : memref<4x384xf32, #tpu.memory_space<vmem>>, vector<4x256xf32>
    %cst_58 = arith.constant 0.000000e+00 : f32
    %90 = vector.shape_cast %24 : vector<1x256xi1> to vector<1x256xi1>
    %91 = vector.broadcast %90 : vector<1x256xi1> to vector<4x256xi1>
    %92 = vector.broadcast %cst_58 : f32 to vector<4x256xf32>
    %93 = arith.select %91, %89, %92 : vector<4x256xi1>, vector<4x256xf32>
    %c0_59 = arith.constant 0 : index
    %c0_60 = arith.constant 0 : index
    %94 = vector.load %arg9[%c0_59, %c0_60] : memref<36x256xf32, #tpu.memory_space<vmem>>, vector<4x256xf32>
    tpu.vector_store %arg9[%c0_59, %c0_60], %93 {strides = array<i32>} : memref<36x256xf32, #tpu.memory_space<vmem>>, vector<4x256xf32>,
    %c0_61 = arith.constant 0 : index
    %c1_62 = arith.constant 1 : index
    %95 = vector.load %arg8[%c0_61, %c1_62] : memref<4x384xf32, #tpu.memory_space<vmem>>, vector<4x256xf32>
    %c4_63 = arith.constant 4 : index
    %c0_64 = arith.constant 0 : index
    %96 = vector.load %arg9[%c4_63, %c0_64] : memref<36x256xf32, #tpu.memory_space<vmem>>, vector<4x256xf32>
    tpu.vector_store %arg9[%c4_63, %c0_64], %95 {strides = array<i32>} : memref<36x256xf32, #tpu.memory_space<vmem>>, vector<4x256xf32>,
    %c0_65 = arith.constant 0 : index
    %c2_66 = arith.constant 2 : index
    %97 = vector.load %arg8[%c0_65, %c2_66] : memref<4x384xf32, #tpu.memory_space<vmem>>, vector<4x256xf32>
    %cst_67 = arith.constant 0.000000e+00 : f32
    %98 = vector.shape_cast %26 : vector<1x256xi1> to vector<1x256xi1>
    %99 = vector.broadcast %98 : vector<1x256xi1> to vector<4x256xi1>
    %100 = vector.broadcast %cst_67 : f32 to vector<4x256xf32>
    %101 = arith.select %99, %97, %100 : vector<4x256xi1>, vector<4x256xf32>
    %c8_68 = arith.constant 8 : index
    %c0_69 = arith.constant 0 : index
    %102 = vector.load %arg9[%c8_68, %c0_69] : memref<36x256xf32, #tpu.memory_space<vmem>>, vector<4x256xf32>
    tpu.vector_store %arg9[%c8_68, %c0_69], %101 {strides = array<i32>} : memref<36x256xf32, #tpu.memory_space<vmem>>, vector<4x256xf32>,
    %c0_70 = arith.constant 0 : index
    %c16_71 = arith.constant 16 : index
    %103 = vector.load %arg8[%c0_70, %c16_71] : memref<4x384xf32, #tpu.memory_space<vmem>>, vector<4x256xf32>
    %cst_72 = arith.constant 0.000000e+00 : f32
    %104 = vector.shape_cast %24 : vector<1x256xi1> to vector<1x256xi1>
    %105 = vector.broadcast %104 : vector<1x256xi1> to vector<4x256xi1>
    %106 = vector.broadcast %cst_72 : f32 to vector<4x256xf32>
    %107 = arith.select %105, %103, %106 : vector<4x256xi1>, vector<4x256xf32>
    %c12_73 = arith.constant 12 : index
    %c0_74 = arith.constant 0 : index
    %108 = vector.load %arg9[%c12_73, %c0_74] : memref<36x256xf32, #tpu.memory_space<vmem>>, vector<4x256xf32>
    tpu.vector_store %arg9[%c12_73, %c0_74], %107 {strides = array<i32>} : memref<36x256xf32, #tpu.memory_space<vmem>>, vector<4x256xf32>,
    %c0_75 = arith.constant 0 : index
    %c17_76 = arith.constant 17 : index
    %109 = vector.load %arg8[%c0_75, %c17_76] : memref<4x384xf32, #tpu.memory_space<vmem>>, vector<4x256xf32>
    %c16_77 = arith.constant 16 : index
    %c0_78 = arith.constant 0 : index
    %110 = vector.load %arg9[%c16_77, %c0_78] : memref<36x256xf32, #tpu.memory_space<vmem>>, vector<4x256xf32>
    tpu.vector_store %arg9[%c16_77, %c0_78], %109 {strides = array<i32>} : memref<36x256xf32, #tpu.memory_space<vmem>>, vector<4x256xf32>,
    %c0_79 = arith.constant 0 : index
    %c18_80 = arith.constant 18 : index
    %111 = vector.load %arg8[%c0_79, %c18_80] : memref<4x384xf32, #tpu.memory_space<vmem>>, vector<4x256xf32>
    %cst_81 = arith.constant 0.000000e+00 : f32
    %112 = vector.shape_cast %26 : vector<1x256xi1> to vector<1x256xi1>
    %113 = vector.broadcast %112 : vector<1x256xi1> to vector<4x256xi1>
    %114 = vector.broadcast %cst_81 : f32 to vector<4x256xf32>
    %115 = arith.select %113, %111, %114 : vector<4x256xi1>, vector<4x256xf32>
    %c20_82 = arith.constant 20 : index
    %c0_83 = arith.constant 0 : index
    %116 = vector.load %arg9[%c20_82, %c0_83] : memref<36x256xf32, #tpu.memory_space<vmem>>, vector<4x256xf32>
    tpu.vector_store %arg9[%c20_82, %c0_83], %115 {strides = array<i32>} : memref<36x256xf32, #tpu.memory_space<vmem>>, vector<4x256xf32>,
    %c0_84 = arith.constant 0 : index
    %c32_85 = arith.constant 32 : index
    %117 = vector.load %arg8[%c0_84, %c32_85] : memref<4x384xf32, #tpu.memory_space<vmem>>, vector<4x256xf32>
    %cst_86 = arith.constant 0.000000e+00 : f32
    %118 = vector.shape_cast %24 : vector<1x256xi1> to vector<1x256xi1>
    %119 = vector.broadcast %118 : vector<1x256xi1> to vector<4x256xi1>
    %120 = vector.broadcast %cst_86 : f32 to vector<4x256xf32>
    %121 = arith.select %119, %117, %120 : vector<4x256xi1>, vector<4x256xf32>
    %c24_87 = arith.constant 24 : index
    %c0_88 = arith.constant 0 : index
    %122 = vector.load %arg9[%c24_87, %c0_88] : memref<36x256xf32, #tpu.memory_space<vmem>>, vector<4x256xf32>
    tpu.vector_store %arg9[%c24_87, %c0_88], %121 {strides = array<i32>} : memref<36x256xf32, #tpu.memory_space<vmem>>, vector<4x256xf32>,
    %c0_89 = arith.constant 0 : index
    %c33_90 = arith.constant 33 : index
    %123 = vector.load %arg8[%c0_89, %c33_90] : memref<4x384xf32, #tpu.memory_space<vmem>>, vector<4x256xf32>
    %c28_91 = arith.constant 28 : index
    %c0_92 = arith.constant 0 : index
    %124 = vector.load %arg9[%c28_91, %c0_92] : memref<36x256xf32, #tpu.memory_space<vmem>>, vector<4x256xf32>
    tpu.vector_store %arg9[%c28_91, %c0_92], %123 {strides = array<i32>} : memref<36x256xf32, #tpu.memory_space<vmem>>, vector<4x256xf32>,
    %c0_93 = arith.constant 0 : index
    %c34_94 = arith.constant 34 : index
    %125 = vector.load %arg8[%c0_93, %c34_94] : memref<4x384xf32, #tpu.memory_space<vmem>>, vector<4x256xf32>
    %cst_95 = arith.constant 0.000000e+00 : f32
    %126 = vector.shape_cast %26 : vector<1x256xi1> to vector<1x256xi1>
    %127 = vector.broadcast %126 : vector<1x256xi1> to vector<4x256xi1>
    %128 = vector.broadcast %cst_95 : f32 to vector<4x256xf32>
    %129 = arith.select %127, %125, %128 : vector<4x256xi1>, vector<4x256xf32>
    %c32_96 = arith.constant 32 : index
    %c0_97 = arith.constant 0 : index
    %130 = vector.load %arg9[%c32_96, %c0_97] : memref<36x256xf32, #tpu.memory_space<vmem>>, vector<4x256xf32>
    tpu.vector_store %arg9[%c32_96, %c0_97], %129 {strides = array<i32>} : memref<36x256xf32, #tpu.memory_space<vmem>>, vector<4x256xf32>,
    %c0_98 = arith.constant 0 : index
    %c0_99 = arith.constant 0 : index
    %131 = vector.load %arg9[%c0_98, %c0_99] : memref<36x256xf32, #tpu.memory_space<vmem>>, vector<36x256xf32>
    %c0_100 = arith.constant 0 : index
    %c0_101 = arith.constant 0 : index
    %132 = vector.load %arg4[%c0_100, %c0_101] : memref<8x36xf32, #tpu.memory_space<vmem>>, vector<8x36xf32>
    %cst_102 = arith.constant dense<0.000000e+00> : vector<8x256xf32>
    %133 = tpu.matmul %132, %131, %cst_102 {dimension_numbers = #tpu.dot_dimension_numbers<[1], [0], [0], [1], [0, 0, 1, 1], [], []>} : vector<8x36xf32>, vector<36x256xf32>, vector<8x256xf32> -> vector<8x256xf32>
    %c0_103 = arith.constant 0 : index
    %c0_104 = arith.constant 0 : index
    %134 = vector.load %arg5[%c0_103, %c0_104] : memref<8x1xf32, #tpu.memory_space<vmem>>, vector<8x1xf32>
    %135 = vector.broadcast %134 : vector<8x1xf32> to vector<8x256xf32>
    %136 = arith.addf %133, %135 : vector<8x256xf32>
    %cst_105 = arith.constant 1.000000e-01 : f32
    %137 = vector.broadcast %cst_105 : f32 to vector<8x256xf32>
    %138 = arith.mulf %137, %136 : vector<8x256xf32>
    %139 = arith.addf %28, %138 : vector<8x256xf32>
    %c0_106 = arith.constant 0 : index
    %c0_107 = arith.constant 0 : index
    %c0_108 = arith.constant 0 : index
    %140 = vector.load %arg7[%c0_106, %c0_107, %c0_108] : memref<1x8x256xf32, #tpu.memory_space<vmem>>, vector<1x8x256xf32>
    %141 = vector.shape_cast %140 : vector<1x8x256xf32> to vector<8x256xf32>
    %142 = vector.shape_cast %139 : vector<8x256xf32> to vector<1x8x256xf32>
    tpu.vector_store %arg7[%c0_106, %c0_107, %c0_108], %142 {strides = array<i32>} : memref<1x8x256xf32, #tpu.memory_space<vmem>>, vector<1x8x256xf32>,
    return
  }
  func.func @transform_0(%arg0: i32) -> (i32, i32, i32) {
    %c0_i32 = arith.constant 0 : i32
    %c0_i32_0 = arith.constant 0 : i32
    %c0_i32_1 = arith.constant 0 : i32
    return %arg0, %c0_i32, %c0_i32_0 : i32, i32, i32
  }
  func.func @transform_1(%arg0: i32) -> (i32, i32) {
    %c0_i32 = arith.constant 0 : i32
    %c0_i32_0 = arith.constant 0 : i32
    %c0_i32_1 = arith.constant 0 : i32
    return %c0_i32, %c0_i32_0 : i32, i32
  }
  func.func @transform_2(%arg0: i32) -> (i32, i32) {
    %c0_i32 = arith.constant 0 : i32
    %c0_i32_0 = arith.constant 0 : i32
    %c0_i32_1 = arith.constant 0 : i32
    return %c0_i32, %c0_i32_0 : i32, i32
  }
  func.func @transform_3(%arg0: i32) -> (i32, i32) {
    %c0_i32 = arith.constant 0 : i32
    %c0_i32_0 = arith.constant 0 : i32
    %c0_i32_1 = arith.constant 0 : i32
    return %c0_i32, %c0_i32_0 : i32, i32
  }
  func.func @transform_4(%arg0: i32) -> (i32, i32) {
    %c0_i32 = arith.constant 0 : i32
    %c0_i32_0 = arith.constant 0 : i32
    %c0_i32_1 = arith.constant 0 : i32
    return %c0_i32, %c0_i32_0 : i32, i32
  }
  func.func @transform_5(%arg0: i32) -> (i32, i32) {
    %c0_i32 = arith.constant 0 : i32
    %c0_i32_0 = arith.constant 0 : i32
    %c0_i32_1 = arith.constant 0 : i32
    return %c0_i32, %c0_i32_0 : i32, i32
  }
  func.func @transform_6(%arg0: i32) -> (i32, i32, i32) {
    %c0_i32 = arith.constant 0 : i32
    %c0_i32_0 = arith.constant 0 : i32
    %c0_i32_1 = arith.constant 0 : i32
    return %arg0, %c0_i32, %c0_i32_0 : i32, i32, i32
  }
}

</mosaic_0001>

<bundles_post_ra>
// kernel: tpu_custom_call.1
= control target key start
LH: loop header
LB: loop body
LE: loop exit
PB: predicated region body
PF: predicated region fallthrough
CT: control target
= control target key end

     0   :  { %11 = vsyncpa [#allocation5], 0  ;;  %s1609_s0 = inlined_call_operand.vmem [shape: f32[2,4,256], index: 0, kind: input, shape index: {}]   ;;  %s1610_s1 = inlined_call_operand.hbm [shape: f32[4,36], index: 1, kind: input, shape index: {}]   ;;  %s1611_s2 = inlined_call_operand.vmem [shape: f32[4,1], index: 2, kind: input, shape index: {}]   ;;  %s1612_s3 = inlined_call_operand.vmem [shape: f32[8,36], index: 3, kind: input, shape index: {}]   ;;  %s1613_s4 = inlined_call_operand.vmem [shape: f32[8,1], index: 4, kind: input, shape index: {}]   ;;  %s1614_s5 = inlined_call_operand.vmem [shape: f32[8,4], index: 5, kind: input, shape index: {}]   ;;  %s1615_s6 = inlined_call_operand.hbm [shape: f32[2,8,256], index: 6, kind: output, shape index: {}]  }
   0x1   :  { %12 = vsyncpa [#allocation6], 0 }
   0x2   :  { %14 = vsyncpa [#allocation6 + $0x1], 0  ;;  %s1287_s21 = smov 0   ;;  %s1289_s22 = smov 0  }
   0x3   :  { %s1291_s23 = smov 0   ;;  %s1293_s24 = smov 0  }
   0x4 LB: > { %s1308_s25 = sadd.s32 4294967295, %s1237_s24   ;;  %s1051_s26 = sadd.s32 4294967294, %s1237_s24   ;;  %s1237_s24 = sphi %s1293_s24, %s1642_s24   ;;  %s1233_s23 = sphi %s1291_s23, %s1641_s23   ;;  %s1229_s22 = sphi %s1289_s22, %s1640_s22   ;;  %s1225_s21 = sphi %s1287_s21, %s1639_s21  }
   0x5   : > { %s1312_s27 = sadd.s32 1, %s1237_s24   ;;  %s158_s28 = sadd.s32 1, %s1233_s23 }
   0x6   : > { %s155_s29 = ssub.s32 %s1237_s24, %s1312_s27  ;;  %p168_p0 = scmp.ne.s32.totalorder %s1233_s23, %s1229_s22 }
   0x7   : > { %p156_p1 = scmp.eq.s32.totalorder %s155_s29, 0  ;;  %p169_p2 = scmp.eq.s32.totalorder %s1308_s25, 1 }
   0x8   : > { %p174_p3 = scmp.ne.s32.totalorder %s1229_s22, %s1225_s21  ;;  %p175_p4 = scmp.eq.s32.totalorder %s1051_s26, 1 }
   0x9   : > { %s1323_s30 = scalar_select %p156_p1, %s1233_s23, %s158_s28  }
   0xa   : > { %p1325_p5 = por %p169_p2, %p168_p0  ;;  %p1329_p6 = por %p175_p4, %p174_p3 }
   0xb   : > { %p1052_p7 = scmp.ge.s32.totalorder %s1237_s24, 1  ;;  %p182_p8 = scmp.lt.s32.totalorder %s1237_s24, 3 }
   0xc   : > { %s1620_s8 = scalar_select %p1329_p6, 1, 0 }
   0xd   : > { %p1090_p9 = scmp.eq.s32.totalorder %s1308_s25, 0  ;;  %p1336_p10 = pnand %p1052_p7, %p182_p8 }
   0xe   : > { %s1239_s10 = smov [#allocation4]  }
   0xf   : > { %s195_s11 = sshll.u32 %s1239_s10, 4  ;;  %p1082_p11 = pneg %p1336_p10  ;;  %s196_s11 = int_to_ptr.vmem [resolvable:$true] %s195_s11 }
  0x10   : > { %s1158_s12 = scalar_lea.vmem %s196_s11, 64  ;;  %p1166_p3 = scmp.lt.s32.totalorder %s196_s11, %s196_s11 }
  0x11   : > { %p1083_p12 = pnand %p1090_p9, %p1082_p11  ;;  %p1159_p0 = scmp.ne.s32.totalorder %s196_s11, %s1158_s12 }
  0x12   : > { %p1167_p4 = scmp.lt.s32.totalorder %s1158_s12, %s1158_s12 }
  0x13   : > { %p1149_p13 = pneg %p1083_p12 }
  0x14   : > { %p1168_p6 = por %p1167_p4, %p1166_p3 }
  0x15   : > { %p1161_p1 = pnand %p1159_p0, %p1149_p13 }
  0x17   : > { %p1162_p2 = pneg %p1161_p1 }
  0x19   : > { %p1169_p7 = pnand %p1168_p6, %p1162_p2 }
  0x1b   : > { %1172 = shalt.err (!%p1169_p7)
}
  0x1c   : > { %1085 = dma.hbm_to_vmem [thread:$0]  (!%p1083_p12), %s1610_s1, 64, %s196_s11, [#allocation5]  }
  0x1d   : > { %228 = sbr.rel (%p1336_p10) target bundleno = 1052 (0x41c), region = 44 }
  0x22   : > { %1216 = dma.done.wait (%p1090_p9), [#allocation5], 64  }
  0x23   : > { %1218 = vsyncadd (%p1090_p9), [#allocation5], 4294967232  ;;  %p258_p8 = scmp.lt.s32.totalorder %s1308_s25, 1  ;;  %vm263_vm0 = vcmask 134144   ;;  %vm265_vm1 = vcmask 1043592   ;;  %v1240_v0 = vmov 0.0   ;;  %v268_v4 = vlaneseq }
  0x24   : > { %264 = vst.msk [vmem:[#allocation2] sm:$0xf] %vm263_vm0, %v1240_v0  ;;  %591 = vmatprep.mubr.f32.mxu0 %v1240_v0  ;;  %873 = vmatprep.mubr.f32.mxu1 %v1240_v0  ;;  %s1241_s20 = smov 17   ;;  %vm311_vm3 = vcmask 1047556   ;;  %vm307_vm4 = vcmask 138240   ;;  %s1242_s26 = smov 94  }
  0x25   : > { %s259_s15 = scalar_select %p258_p8, %s1308_s25, 1  ;;  %266 = vst.msk [vmem:[#allocation2 + $0x8] sm:$0xf] %vm265_vm1, %v1240_v0  ;;  %v1370_v5 = vand.u32 127, %v268_v4  ;;  %vm1373_vm5 = vmor %vm311_vm3, %vm265_vm1  ;;  %v1250_v28 = vmov 0   ;;  %vm490_vm8 = vcmask 769024  }
  0x26   : > { %s1243_s28 = smov 110   ;;  %s1244_s29 = smov 95   ;;  %1137 = vset.pattern.permute.xlu1 %v1250_v28  ;;  %1138 = vset.pattern.permute.xlu0 %v1250_v28  ;;  %v510_v29 = vld [vmem:[%s1611_s2] sm:$0xf]  ;;  %vm425_vm10 = vcmask 900096   ;;  %vm451_vm12 = vcmask 785408  }
  0x27   : > { %s1074_s16 = sshll.u32 %s259_s15, 3  ;;  %v1380_v10 = vadd.s32 128, %v1370_v5  ;;  %v275_v12 = vand.u32 15, %v1370_v5  ;;  %s1245_s9 = smov 96   ;;  %vm520_vm13 = vcmask 1043456   ;;  %vm381_vm14 = vcmask 916480  }
  0x28   : > { %s262_s19 = scalar_lea.vmem %s1609_s0, %s1074_s16  ;;  %s1246_s10 = smov 111   ;;  %vm472_vm15 = vcmask 777216   ;;  %vm1618_vm1 = vcmask 908288   ;;  %vm1617_vm3 = vcmask 1039360  }
  0x29   : > { %v1364_v1 = vld [vmem:[%s262_s19] sm:$0xff]  ;;  %v282_v11 = vand.u32 15, %v1380_v10  ;;  %vm1395_vm7 = vcmp.ge.s32.totalorder %v275_v12, 1  ;;  %s1247_s11 = smov 112   ;;  %s1248_s12 = smov 127   ;;  %vm1442_vm11 = vcmp.le.s32.totalorder %v275_v12, 14 }
  0x2a   : > { %vm300_vm2 = vcmp.gt.f32.partialorder %v1364_v1, 0.0  ;;  %v301_v2 = vmul.f32 0.2, %v1364_v1  ;;  %s1249_s13 = smov 126  }
  0x2b   : > { %vm1389_vm6 = vcmp.ge.s32.totalorder %v282_v11, 1  ;;  %vm1433_vm9 = vcmp.le.s32.totalorder %v282_v11, 14 }
  0x2c   : > { %v302_v3 = vsel %vm300_vm2, %v1364_v1, %v301_v2  ;;  %vm1616_vm2 = vcmask 1031168  }
  0x2d   : > { %304 = vrot.lane.b32.xlu0 %v302_v3, %s1241_s20 }
  0x9f   : > { %v305_v6 = vpop.permute.xlu0 %304 }
  0xa0   : > { %v306_v8 = vrot.slane %v305_v6, 4 }
  0xa2   : > { %v308_v9 = vsel %vm307_vm4, %v306_v8, %v305_v6  ;;  %314 = vst.msk [vmem:[#allocation2 + $0x8] sm:$0xf] %vm263_vm0, %v306_v8 }
  0xa3   : > { %313 = vst.msk [vmem:[#allocation2] sm:$0xff] %vm1373_vm5, %v308_v9 }
  0xa9   : > { %v480_v13 = vld [vmem:[#allocation2 + $0x8] sm:$0xf] }
  0xaa   : > { %488 = vrot.lane.b32.xlu1 %v480_v13, %s1242_s26  ;;  %v414_v14 = vld [vmem:[#allocation2] sm:$0xff]  ;;  %v415_v18 = vld [vmem:[#allocation2 + $0x8] sm:$0xf] }
  0xab   : > { %419 = vrot.lane.b32.xlu0 %v414_v14, %s1243_s28  ;;  %v483_v17 = vcombine.high %v414_v14, %v414_v14  ;;  %v323_v20 = vsel %vm1395_vm7, %v414_v14, 0.0  ;;  %v441_v21 = vld [vmem:[#allocation2 + $0x8] sm:$0xf]  ;;  %v464_v25 = vcombine.low %v414_v14, %v414_v14 }
  0xac   : > { %325 = vst [vmem:[#allocation3 + $0x30] sm:$0xf] %v323_v20  ;;  %v371_v22 = vld [vmem:[#allocation2 + $0x8] sm:$0xf] }
  0xad   : > { %v324_v19 = vsel %vm1389_vm6, %v483_v17, 0.0  ;;  %v397_v23 = vld [vmem:[#allocation2 + $0x8] sm:$0xf] }
  0xae   : > { %423 = vrot.lane.b32.xlu1 %v415_v18, %s1243_s28  ;;  %326 = vst [vmem:[#allocation3] sm:$0xf] %v324_v19  ;;  %v347_v24 = vld [vmem:[#allocation2 + $0x8] sm:$0xf] }
  0xaf   : > { %468 = vrot.lane.b32.xlu0 %v414_v14, %s1244_s29  ;;  %v1141_v26 = vld [vmem:[#allocation2 + $0x8] ss:$0 sps:$4 sm:$0xff]  }
  0xb0   : > { %v1142_v27 = vld [vmem:[#allocation2 + $0x8] ss:$0 sps:$4 sm:$0xff]  }
  0xb2   : > { %449 = vrot.lane.b32.xlu1 %v441_v21, %s1245_s9 }
  0xb3   : > { %401 = vrot.lane.b32.xlu0 %v414_v14, %s1246_s10 }
  0xb6   : > { %379 = vrot.lane.b32.xlu1 %v371_v22, %s1247_s11 }
  0xb7   : > { %335 = vrot.lane.b32.xlu0 %v414_v14, %s1248_s12 }
  0xba   : > { %405 = vrot.lane.b32.xlu1 %v397_v23, %s1246_s10 }
  0xbb   : > { %486 = vrot.lane.b32.xlu0 %v483_v17, %s1242_s26 }
  0xbe   : > { %359 = vrot.lane.b32.xlu1 %v347_v24, %s1249_s13 }
  0xbf   : > { %421 = vrot.lane.b32.xlu0 %v483_v17, %s1243_s28 }
  0xc2   : > { %484 = vrot.lane.b32.xlu1 %v414_v14, %s1242_s26 }
  0xc3   : > { %447 = vrot.lane.b32.xlu0 %v483_v17, %s1245_s9 }
  0xc6   : > { %445 = vrot.lane.b32.xlu1 %v414_v14, %s1245_s9 }
  0xc7   : > { %377 = vrot.lane.b32.xlu0 %v483_v17, %s1247_s11 }
  0xca   : > { %375 = vrot.lane.b32.xlu1 %v414_v14, %s1247_s11 }
  0xcb   : > { %466 = vrot.lane.b32.xlu0 %v464_v25, %s1244_s29 }
  0xce   : > { %470 = vrot.lane.b32.xlu1 %v1141_v26, %s1244_s29 }
  0xcf   : > { %403 = vrot.lane.b32.xlu0 %v483_v17, %s1246_s10 }
  0xd2   : > { %355 = vrot.lane.b32.xlu1 %v414_v14, %s1249_s13 }
  0xd3   : > { %357 = vrot.lane.b32.xlu0 %v483_v17, %s1249_s13 }
  0xd6   : > { %337 = vrot.lane.b32.xlu1 %v1142_v27, %s1248_s12 }
  0xd7   : > { %333 = vrot.lane.b32.xlu0 %v464_v25, %s1248_s12 }
  0xda   : > { %513 = vperm.xlu1 %1137, %v510_v29  }
 0x11c   : > { %v489_v30 = vpop.permute.xlu1 %488 }
 0x11d   : > { %v420_v31 = vpop.permute.xlu0 %419 }
 0x120   : > { %v424_v32 = vpop.permute.xlu1 %423 }
 0x121   : > { %v469_v33 = vpop.permute.xlu0 %468 }
 0x124   : > { %v450_v34 = vpop.permute.xlu1 %449 }
 0x125   : > { %v402_v35 = vpop.permute.xlu0 %401 }
 0x128   : > { %v380_v36 = vpop.permute.xlu1 %379 }
 0x129   : > { %v1429_v37 = vpop.permute.xlu0 %335 }
 0x12c   : > { %v406_v38 = vpop.permute.xlu1 %405 }
 0x12d   : > { %v487_v40 = vpop.permute.xlu0 %486 }
 0x12e   : > { %v492_v41 = vsel %vm490_vm8, %v487_v40, %v489_v30 }
 0x12f   : > { %v496_v42 = vsel %vm1433_vm9, %v492_v41, 0.0 }
 0x130   : > { %498 = vst [vmem:[#allocation3 + $0x38] sm:$0xf] %v496_v42  ;;  %v360_v43 = vpop.permute.xlu1 %359 }
 0x131   : > { %v422_v45 = vpop.permute.xlu0 %421 }
 0x132   : > { %v426_v46 = vsel %vm425_vm10, %v420_v31, %v422_v45  ;;  %v427_v47 = vsel %vm425_vm10, %v422_v45, %v424_v32 }
 0x133   : > { %v430_v48 = vsel %vm1442_vm11, %v426_v46, 0.0  ;;  %v431_v49 = vsel %vm1433_vm9, %v427_v47, 0.0 }
 0x134   : > { %v434_v50 = vrot.slane %v430_v48, 4  ;;  %v435_v51 = vrot.slane %v431_v49, 4  ;;  %v485_v52 = vpop.permute.xlu1 %484 }
 0x135   : > { %v491_v53 = vsel %vm490_vm8, %v485_v52, %v487_v40  ;;  %v448_v54 = vpop.permute.xlu0 %447 }
 0x136   : > { %438 = vst [vmem:[#allocation3 + $0x48] sm:$0xf0] %v434_v50  ;;  %439 = vst [vmem:[#allocation3 + $0x28] sm:$0xf0] %v435_v51  ;;  %v495_v55 = vsel %vm1442_vm11, %v491_v53, 0.0  ;;  %v453_v56 = vsel %vm451_vm12, %v448_v54, %v450_v34 }
 0x137   : > { %497 = vst [vmem:[#allocation3 + $0x40] sm:$0xf] %v495_v55  ;;  %v457_v57 = vsel %vm1389_vm6, %v453_v56, 0.0  ;;  %v508_v58 = vld [vmem:[#allocation3 + $0x38] sm:$0xf] }
 0x138   : > { %459 = vst [vmem:[#allocation3 + $0x20] sm:$0xf] %v457_v57  ;;  %v446_v59 = vpop.permute.xlu1 %445  ;;  %1060 = vmatprep.subr.msk.mxu0 %vm520_vm13, %v508_v58 }
 0x139   : > { %v452_v60 = vsel %vm451_vm12, %v446_v59, %v448_v54  ;;  %v378_v61 = vpop.permute.xlu0 %377 }
 0x13a   : > { %v456_v62 = vsel %vm1395_vm7, %v452_v60, 0.0  ;;  %v383_v63 = vsel %vm381_vm14, %v378_v61, %v380_v36  ;;  %v509_v36 = vld [vmem:[#allocation4] sm:$0xf] }
 0x13b   : > { %458 = vst [vmem:[#allocation3 + $0x8] sm:$0xf] %v456_v62  ;;  %v387_v2 = vsel %vm1389_vm6, %v383_v63, 0.0  ;;  %v883_v63 = vcombine.high %v1364_v1, %v1364_v1 }
 0x13c   : > { %v391_v3 = vrot.slane %v387_v2, 4  ;;  %v376_v4 = vpop.permute.xlu1 %375 }
 0x13d   : > { %v382_v5 = vsel %vm381_vm14, %v376_v4, %v378_v61  ;;  %v467_v6 = vpop.permute.xlu0 %466  ;;  %v794_v4 = vld [vmem:[%s1613_s4] sm:$0xff] }
 0x13e   : > { %395 = vst [vmem:[#allocation3 + $0x10] sm:$0xf0] %v391_v3  ;;  %v386_v8 = vsel %vm1395_vm7, %v382_v5, 0.0  ;;  %v473_v9 = vsel %vm472_vm15, %v467_v6, %v469_v33  ;;  %v507_v10 = vld [vmem:[#allocation3 + $0x40] sm:$0xf]  ;;  %v299_v3 = vld [vmem:[%s1614_s5] sm:$0xff] }
 0x13f   : > { %v390_v11 = vrot.slane %v386_v8, 4  ;;  %477 = vst [vmem:[#allocation3 + $0x8] sm:$0xf0] %v473_v9  ;;  %1061 = vmatpush1.msk.msra.mxu0 %vm520_vm13, %v507_v10 }
 0x140   : > { %v471_v12 = vpop.permute.xlu1 %470 }
 0x141   : > { %394 = vst [vmem:[#allocation3 + $0x18] sm:$0xf0] %v390_v11  ;;  %v474_v13 = vsel %vm472_vm15, %v469_v33, %v471_v12  ;;  %v404_v14 = vpop.permute.xlu0 %403 }
 0x142   : > { %478 = vst [vmem:[#allocation3 + $0x20] sm:$0xf0] %v474_v13  ;;  %v408_v17 = vsel %vm1618_vm1, %v402_v35, %v404_v14  ;;  %v409_v18 = vsel %vm1618_vm1, %v404_v14, %v406_v38 }
 0x143   : > { %412 = vst [vmem:[#allocation3 + $0x48] sm:$0xf] %v408_v17  ;;  %413 = vst [vmem:[#allocation3 + $0x28] sm:$0xf] %v409_v18 }
 0x144   : > { %v356_v19 = vpop.permute.xlu1 %355 }
 0x145   : > { %v358_v20 = vpop.permute.xlu0 %357 }
 0x146   : > { %v362_v21 = vsel %vm1616_vm2, %v356_v19, %v358_v20  ;;  %v363_v22 = vsel %vm1616_vm2, %v358_v20, %v360_v43  ;;  %v505_v30 = vld [vmem:[#allocation3 + $0x8] sm:$0xff]  ;;  %vm516_vm2 = vcmask 293888  }
 0x147   : > { %v366_v23 = vsel %vm1442_vm11, %v362_v21, 0.0  ;;  %v367_v24 = vsel %vm1433_vm9, %v363_v22, 0.0 }
 0x148   : > { %368 = vst [vmem:[#allocation3 + $0x18] sm:$0xf] %v366_v23  ;;  %369 = vst [vmem:[#allocation3 + $0x10] sm:$0xf] %v367_v24  ;;  %v338_v25 = vpop.permute.xlu1 %337 }
 0x149   : > { %v341_v26 = vsel %vm1617_vm3, %v1429_v37, %v338_v25  ;;  %v334_v27 = vpop.permute.xlu0 %333  ;;  %v506_v28 = vld [vmem:[#allocation3 + $0x20] sm:$0xff] }
 0x14a   : > { %345 = vst [vmem:[#allocation3] sm:$0xf0] %v341_v26  ;;  %v340_v29 = vsel %vm1617_vm3, %v334_v27, %v1429_v37  ;;  %551 = vmatprep.subr.mxu0 %v506_v28  ;;  %v504_v31 = vld [vmem:[#allocation3 + $0x28] sm:$0xff] }
 0x14b   : > { %344 = vst [vmem:[#allocation3 + $0x30] sm:$0xf0] %v340_v29  ;;  %552 = vmatpush1.msra.mxu0 %v505_v30  ;;  %v503_v32 = vld [vmem:[#allocation3 + $0x48] sm:$0xff] }
 0x14c   : > { %553 = vmatprep.subr.mxu0 %v504_v31 }
 0x14d   : > { %554 = vmatpush1.msra.mxu0 %v503_v32 }
 0x14f   : > { %v502_v33 = vld [vmem:[#allocation3 + $0x10] sm:$0xff]  ;;  %v501_v34 = vld [vmem:[#allocation3 + $0x18] sm:$0xff] }
 0x150   : > { %555 = vmatprep.subr.mxu0 %v502_v33 }
 0x151   : > { %556 = vmatpush1.msra.mxu0 %v501_v34  ;;  %v500_v35 = vld [vmem:[#allocation3] sm:$0xff] }
 0x152   : > { %557 = vmatprep.subr.mxu0 %v500_v35  ;;  %v499_v38 = vld [vmem:[#allocation3 + $0x30] sm:$0xff] }
 0x153   : > { %558 = vmatpush1.msra.mxu0 %v499_v38 }
 0x154   : > { %1062 = vmatmul.mubr.msk.f32.vlgmr.msra.gmra.mxu0 %vm516_vm2, %v509_v36  ;;  %1066 = vmatprep.subr.msk.mxu0 %vm520_vm13, %v883_v63 }
 0x155   : > { %956 = vmatprep.mubr.f32.mxu0 %v1240_v0  ;;  %v514_v37 = vpop.permute.xlu1 %513  ;;  %1067 = vmatpush1.msk.msra.mxu0 %vm520_vm13, %v1364_v1 }
 0x214   : > { %v593_v40 = vpop.f32.mrf.mxu0 }
 0x215   : > { %v594_v41 = vadd.f32 %v593_v40, %v514_v37 }
 0x216   : > { %v595_v42 = vpop.f32.mrf.mxu0 }
 0x217   : > { %v600_v43 = vmul.f32 0.2, %v594_v41  ;;  %v596_v45 = vadd.f32 %v595_v42, %v514_v37  ;;  %vm598_vm3 = vcmp.gt.f32.partialorder %v594_v41, 0.0 }
 0x219   : > { %vm599_vm1 = vcmp.gt.f32.partialorder %v596_v45, 0.0  ;;  %v601_v46 = vmul.f32 0.2, %v596_v45  ;;  %v602_v47 = vsel %vm598_vm3, %v594_v41, %v600_v43 }
 0x21b   : > { %v603_v48 = vsel %vm599_vm1, %v596_v45, %v601_v46 }
 0x21c   : > { %v606_v49 = vcombine.low %v602_v47, %v603_v48 }
 0x21e   : > { %607 = vrot.lane.b32.xlu0 %v606_v49, %s1241_s20 }
 0x290   : > { %v608_v50 = vpop.permute.xlu0 %607 }
 0x291   : > { %v609_v51 = vrot.slane %v608_v50, 4 }
 0x293   : > { %v610_v52 = vsel %vm307_vm4, %v609_v51, %v608_v50  ;;  %614 = vst.msk [vmem:[#allocation2 + $0x8] sm:$0xf] %vm263_vm0, %v609_v51  ;;  %vm884_vm0 = vcmask 31744   ;;  %vm1632_vm4 = vcmask 908288  }
 0x294   : > { %613 = vst.msk [vmem:[#allocation2] sm:$0xff] %vm1373_vm5, %v610_v52  ;;  %1068 = vmatmul.mubr.msk.f32.vlgmr.msra.gmra.mxu0 %vm884_vm0, %v299_v3  ;;  %vm1633_vm5 = vmmov %vm1632_vm4 }
 0x29a   : > { %v765_v0 = vld [vmem:[#allocation2 + $0x8] sm:$0xf] }
 0x29b   : > { %v703_v53 = vld [vmem:[#allocation2 + $0x8] sm:$0xf]  ;;  %773 = vrot.lane.b32.xlu0 %v765_v0, %s1242_s26  ;;  %v702_v54 = vld [vmem:[#allocation2] sm:$0xff] }
 0x29c   : > { %711 = vrot.lane.b32.xlu1 %v703_v53, %s1243_s28  ;;  %v706_v55 = vcombine.high %v702_v54, %v702_v54  ;;  %v619_v56 = vsel %vm1395_vm7, %v702_v54, 0.0  ;;  %v728_v57 = vld [vmem:[#allocation2 + $0x8] sm:$0xf]  ;;  %v750_v61 = vcombine.low %v702_v54, %v702_v54 }
 0x29d   : > { %621 = vst [vmem:[#allocation3 + $0x30] sm:$0xf] %v619_v56  ;;  %v661_v7 = vld [vmem:[#allocation2 + $0x8] sm:$0xf] }
 0x29e   : > { %v620_v58 = vsel %vm1389_vm6, %v706_v55, 0.0  ;;  %v686_v59 = vld [vmem:[#allocation2 + $0x8] sm:$0xf] }
 0x29f   : > { %707 = vrot.lane.b32.xlu0 %v702_v54, %s1243_s28  ;;  %622 = vst [vmem:[#allocation3] sm:$0xf] %v620_v58  ;;  %v1145_v60 = vld [vmem:[#allocation2 + $0x8] ss:$0 sps:$4 sm:$0xff]  }
 0x2a0   : > { %736 = vrot.lane.b32.xlu1 %v728_v57, %s1245_s9  ;;  %v642_v62 = vld [vmem:[#allocation2 + $0x8] sm:$0xf] }
 0x2a1   : > { %v1146_v2 = vld [vmem:[#allocation2 + $0x8] ss:$0 sps:$4 sm:$0xff]  }
 0x2a3   : > { %754 = vrot.lane.b32.xlu0 %v702_v54, %s1244_s29 }
 0x2a4   : > { %669 = vrot.lane.b32.xlu1 %v661_v7, %s1247_s11 }
 0x2a7   : > { %690 = vrot.lane.b32.xlu0 %v702_v54, %s1246_s10 }
 0x2a8   : > { %694 = vrot.lane.b32.xlu1 %v686_v59, %s1246_s10 }
 0x2ab   : > { %631 = vrot.lane.b32.xlu0 %v702_v54, %s1248_s12 }
 0x2ac   : > { %769 = vrot.lane.b32.xlu1 %v702_v54, %s1242_s26 }
 0x2af   : > { %709 = vrot.lane.b32.xlu0 %v706_v55, %s1243_s28  ;;  %s255_s28 = sand.u32 1, %s1229_s22  }
 0x2b0   : > { %732 = vrot.lane.b32.xlu1 %v702_v54, %s1245_s9  ;;  %s966_s15 = scalar_lea.sflag [#allocation6], %s255_s28 }
 0x2b3   : > { %734 = vrot.lane.b32.xlu0 %v706_v55, %s1245_s9  ;;  %s1075_s9 = sshll.u32 %s1308_s25, 8  ;;  %s1251_s25 = smov [#allocation7]  }
 0x2b4   : > { %665 = vrot.lane.b32.xlu1 %v702_v54, %s1247_s11  ;;  %s978_s14 = scalar_lea.hbm %s1615_s6, %s1075_s9  ;;  %s1177_s17 = sshll.u32 %s1251_s25, 4  ;;  %s1178_s17 = int_to_ptr.vmem [resolvable:$false] %s1177_s17 }
 0x2b5   : > { %s1179_s18 = scalar_lea.vmem %s1178_s17, 512 }
 0x2b7   : > { %667 = vrot.lane.b32.xlu0 %v706_v55, %s1247_s11 }
 0x2b8   : > { %756 = vrot.lane.b32.xlu1 %v1145_v60, %s1244_s29 }
 0x2bb   : > { %752 = vrot.lane.b32.xlu0 %v750_v61, %s1244_s29  ;;  %s1057_s29 = sshll.u32 %s255_s28, 4 }
 0x2bc   : > { %771 = vrot.lane.b32.xlu1 %v706_v55, %s1242_s26 }
 0x2bf   : > { %692 = vrot.lane.b32.xlu0 %v706_v55, %s1246_s10  ;;  %s257_s10 = scalar_lea.vmem [#allocation7], %s1057_s29 }
 0x2c0   : > { %650 = vrot.lane.b32.xlu1 %v642_v62, %s1249_s13  ;;  %s980_s11 = sshll.u32 %s257_s10, 4  ;;  %s981_s11 = int_to_ptr.vmem [resolvable:$true] %s980_s11 }
 0x2c1   : > { %s1173_s16 = scalar_lea.vmem %s981_s11, 256  ;;  %p1180_p11 = scmp.lt.s32.totalorder %s981_s11, %s1178_s17 }
 0x2c2   : > { %p1174_p6 = scmp.ne.s32.totalorder %s981_s11, %s1173_s16  ;;  %p1181_p12 = scmp.lt.s32.totalorder %s1179_s18, %s1173_s16 }
 0x2c3   : > { %648 = vrot.lane.b32.xlu0 %v706_v55, %s1249_s13 }
 0x2c4   : > { %646 = vrot.lane.b32.xlu1 %v702_v54, %s1249_s13  ;;  %p1175_p9 = pnand %p1174_p6, %p1325_p5  ;;  %p1182_p13 = por %p1181_p12, %p1180_p11 }
 0x2c6   : > { %p1176_p10 = pneg %p1175_p9 }
 0x2c7   : > { %629 = vrot.lane.b32.xlu0 %v750_v61, %s1248_s12 }
 0x2c8   : > { %633 = vrot.lane.b32.xlu1 %v1146_v2, %s1248_s12  ;;  %p1183_p0 = pnand %p1182_p13, %p1176_p10 }
 0x2cc   : > { %797 = vperm.xlu1 %1137, %v794_v4  }
 0x30d   : > { %v774_v5 = vpop.permute.xlu0 %773 }
 0x30e   : > { %v712_v6 = vpop.permute.xlu1 %711 }
 0x311   : > { %v708_v9 = vpop.permute.xlu0 %707 }
 0x312   : > { %v737_v8 = vpop.permute.xlu1 %736 }
 0x315   : > { %v755_v11 = vpop.permute.xlu0 %754 }
 0x316   : > { %v670_v10 = vpop.permute.xlu1 %669 }
 0x319   : > { %v691_v13 = vpop.permute.xlu0 %690 }
 0x31a   : > { %v695_v12 = vpop.permute.xlu1 %694 }
 0x31d   : > { %v1529_v17 = vpop.permute.xlu0 %631 }
 0x31e   : > { %v770_v14 = vpop.permute.xlu1 %769 }
 0x321   : > { %v710_v19 = vpop.permute.xlu0 %709 }
 0x322   : > { %v733_v18 = vpop.permute.xlu1 %732  ;;  %v713_v20 = vsel %vm425_vm10, %v708_v9, %v710_v19  ;;  %v714_v21 = vsel %vm425_vm10, %v710_v19, %v712_v6 }
 0x323   : > { %v717_v1 = vsel %vm1442_vm11, %v713_v20, 0.0  ;;  %v718_v22 = vsel %vm1433_vm9, %v714_v21, 0.0 }
 0x324   : > { %v721_v23 = vrot.slane %v717_v1, 4  ;;  %v722_v24 = vrot.slane %v718_v22, 4 }
 0x325   : > { %v735_v26 = vpop.permute.xlu0 %734 }
 0x326   : > { %v666_v25 = vpop.permute.xlu1 %665  ;;  %725 = vst [vmem:[#allocation3 + $0x48] sm:$0xf0] %v721_v23  ;;  %726 = vst [vmem:[#allocation3 + $0x28] sm:$0xf0] %v722_v24  ;;  %v738_v27 = vsel %vm451_vm12, %v733_v18, %v735_v26  ;;  %v739_v28 = vsel %vm451_vm12, %v735_v26, %v737_v8 }
 0x327   : > { %v742_v29 = vsel %vm1395_vm7, %v738_v27, 0.0  ;;  %v743_v30 = vsel %vm1389_vm6, %v739_v28, 0.0 }
 0x328   : > { %744 = vst [vmem:[#allocation3 + $0x8] sm:$0xf] %v742_v29  ;;  %745 = vst [vmem:[#allocation3 + $0x20] sm:$0xf] %v743_v30 }
 0x329   : > { %v668_v32 = vpop.permute.xlu0 %667 }
 0x32a   : > { %v757_v31 = vpop.permute.xlu1 %756  ;;  %v671_v34 = vsel %vm381_vm14, %v666_v25, %v668_v32  ;;  %v672_v35 = vsel %vm381_vm14, %v668_v32, %v670_v10 }
 0x32b   : > { %v759_v33 = vsel %vm472_vm15, %v755_v11, %v757_v31  ;;  %v675_v36 = vsel %vm1395_vm7, %v671_v34, 0.0  ;;  %v676_v38 = vsel %vm1389_vm6, %v672_v35, 0.0  ;;  %vm1634_vm6 = vcmask 1031168  }
 0x32c   : > { %763 = vst [vmem:[#allocation3 + $0x20] sm:$0xf0] %v759_v33  ;;  %v679_v37 = vrot.slane %v675_v36, 4  ;;  %v680_v40 = vrot.slane %v676_v38, 4  ;;  %vm1635_vm7 = vmmov %vm1634_vm6 }
 0x32d   : > { %v753_v42 = vpop.permute.xlu0 %752 }
 0x32e   : > { %v772_v41 = vpop.permute.xlu1 %771  ;;  %683 = vst [vmem:[#allocation3 + $0x18] sm:$0xf0] %v679_v37  ;;  %684 = vst [vmem:[#allocation3 + $0x10] sm:$0xf0] %v680_v40  ;;  %v758_v46 = vsel %vm472_vm15, %v753_v42, %v755_v11 }
 0x32f   : > { %v775_v43 = vsel %vm490_vm8, %v770_v14, %v772_v41  ;;  %v776_v45 = vsel %vm490_vm8, %v772_v41, %v774_v5  ;;  %762 = vst [vmem:[#allocation3 + $0x8] sm:$0xf0] %v758_v46  ;;  %vm1636_vm8 = vcmask 1039360   ;;  %v793_v5 = vld [vmem:[%s1612_s3] sm:$0xff] }
 0x330   : > { %v779_v47 = vsel %vm1442_vm11, %v775_v43, 0.0  ;;  %v780_v16 = vsel %vm1433_vm9, %v776_v45, 0.0  ;;  %vm1637_vm10 = vmmov %vm1636_vm8 }
 0x331   : > { %781 = vst [vmem:[#allocation3 + $0x40] sm:$0xf] %v779_v47  ;;  %782 = vst [vmem:[#allocation3 + $0x38] sm:$0xf] %v780_v16  ;;  %v693_v48 = vpop.permute.xlu0 %692 }
 0x332   : > { %v651_v15 = vpop.permute.xlu1 %650  ;;  %v696_v49 = vsel %vm1632_vm4, %v691_v13, %v693_v48  ;;  %v697_v50 = vsel %vm1633_vm5, %v693_v48, %v695_v12 }
 0x333   : > { %700 = vst [vmem:[#allocation3 + $0x48] sm:$0xf] %v696_v49  ;;  %701 = vst [vmem:[#allocation3 + $0x28] sm:$0xf] %v697_v50  ;;  %v790_v59 = vld [vmem:[#allocation3 + $0x20] sm:$0xff] }
 0x335   : > { %v649_v52 = vpop.permute.xlu0 %648 }
 0x336   : > { %v647_v51 = vpop.permute.xlu1 %646  ;;  %v653_v53 = vsel %vm1635_vm7, %v649_v52, %v651_v15  ;;  %v789_v39 = vld [vmem:[#allocation3 + $0x8] sm:$0xff] }
 0x337   : > { %v652_v0 = vsel %vm1634_vm6, %v647_v51, %v649_v52  ;;  %v657_v55 = vsel %vm1433_vm9, %v653_v53, 0.0 }
 0x338   : > { %v656_v54 = vsel %vm1442_vm11, %v652_v0, 0.0  ;;  %v792_v56 = vld [vmem:[#allocation3 + $0x38] sm:$0xf]  ;;  %v791_v57 = vld [vmem:[#allocation3 + $0x40] sm:$0xf] }
 0x339   : > { %658 = vst [vmem:[#allocation3 + $0x18] sm:$0xf] %v656_v54  ;;  %659 = vst [vmem:[#allocation3 + $0x10] sm:$0xf] %v657_v55  ;;  %1063 = vmatprep.subr.msk.mxu1 %vm520_vm13, %v792_v56  ;;  %v630_v7 = vpop.permute.xlu0 %629 }
 0x33a   : > { %1064 = vmatpush1.msk.msra.mxu1 %vm520_vm13, %v791_v57  ;;  %v634_v58 = vpop.permute.xlu1 %633  ;;  %v635_v44 = vsel %vm1637_vm10, %v630_v7, %v1529_v17  ;;  %v788_v61 = vld [vmem:[#allocation3 + $0x28] sm:$0xff] }
 0x33b   : > { %v636_v60 = vsel %vm1636_vm8, %v1529_v17, %v634_v58  ;;  %833 = vmatprep.subr.mxu1 %v790_v59  ;;  %639 = vst [vmem:[#allocation3 + $0x30] sm:$0xf0] %v635_v44  ;;  %v787_v62 = vld [vmem:[#allocation3 + $0x48] sm:$0xff] }
 0x33c   : > { %640 = vst [vmem:[#allocation3] sm:$0xf0] %v636_v60  ;;  %834 = vmatpush1.msra.mxu1 %v789_v39 }
 0x33d   : > { %835 = vmatprep.subr.mxu1 %v788_v61 }
 0x33e   : > { %836 = vmatpush1.msra.mxu1 %v787_v62 }
 0x340   : > { %v786_v63 = vld [vmem:[#allocation3 + $0x10] sm:$0xff]  ;;  %v785_v2 = vld [vmem:[#allocation3 + $0x18] sm:$0xff] }
 0x341   : > { %837 = vmatprep.subr.mxu1 %v786_v63 }
 0x342   : > { %838 = vmatpush1.msra.mxu1 %v785_v2  ;;  %v783_v4 = vld [vmem:[#allocation3 + $0x30] sm:$0xff] }
 0x343   : > { %v784_v3 = vld [vmem:[#allocation3] sm:$0xff] }
 0x344   : > { %839 = vmatprep.subr.mxu1 %v784_v3 }
 0x345   : > { %840 = vmatpush1.msra.mxu1 %v783_v4 }
 0x346   : > { %1065 = vmatmul.mubr.msk.f32.vlgmr.msra.gmra.mxu1 %vm516_vm2, %v793_v5 }
 0x347   : > { %v798_v6 = vpop.permute.xlu1 %797 }
 0x354   : > { %v958_v11 = vpop.f32.mrf.mxu0 }
 0x356   : > { %v960_v18 = vpop.f32.mrf.mxu0 }
 0x406   : > { %v875_v8 = vpop.f32.mrf.mxu1 }
 0x407   : > { %v876_v9 = vadd.f32 %v875_v8, %v798_v6 }
 0x408   : > { %v877_v10 = vpop.f32.mrf.mxu1 }
 0x409   : > { %v880_v12 = vmul.f32 0.1, %v876_v9  ;;  %v878_v13 = vadd.f32 %v877_v10, %v798_v6 }
 0x40b   : > { %v881_v14 = vmul.f32 0.1, %v878_v13  ;;  %v959_v17 = vadd.f32 %v958_v11, %v880_v12 }
 0x40d   : > { %963 = vst [vmem:[%s257_s10] sm:$0xff] %v959_v17  ;;  %v961_v19 = vadd.f32 %v960_v18, %v881_v14 }
 0x40f   : > { %964 = vst [vmem:[%s257_s10 + $0x8] sm:$0xff] %v961_v19 }
 0x410   : > { %1186 = shalt.err (!%p1183_p0)
}
 0x411   : > { %s1187_s19 = scalar_lea.hbm %s978_s14, 256  ;;  %s1191_s28 = scalar_lea.hbm %s1615_s6, 512 }
 0x412   : > { %p1188_p1 = scmp.ne.s32.totalorder %s978_s14, %s1187_s19  ;;  %p1192_p4 = scmp.lt.s32.totalorder %s978_s14, %s1615_s6 }
 0x413   : > { %p1193_p7 = scmp.lt.s32.totalorder %s1191_s28, %s1187_s19 }
 0x414   : > { %p1189_p2 = pnand %p1188_p1, %p1325_p5 }
 0x415   : > { %p1194_p8 = por %p1193_p7, %p1192_p4 }
 0x416   : > { %p1190_p3 = pneg %p1189_p2 }
 0x418   : > { %p1195_p6 = pnand %p1194_p8, %p1190_p3 }
 0x41a   : > { %1198 = shalt.err (!%p1195_p6)
}
 0x41b   : > { %1080 = dma.vmem_to_hbm [thread:$0]  (%p1325_p5), %s981_s11, 256, %s978_s14, %s966_s15  }
 0x41c PF: > { %p1092_p9 = scmp.ge.s32.totalorder %s1237_s24, 2  ;;  %s992_s10 = sand.u32 1, %s1225_s21  }
 0x41d   : > { %p1638_p10 = scmp.ne.s32.totalorder %s1620_s8, 0  ;;  %s993_s12 = scalar_lea.sflag [#allocation6], %s992_s10 }
 0x41f   : > { %p1087_p11 = pnand %p1092_p9, %p1638_p10 }
 0x421   : > { %p1088_p12 = pneg %p1087_p11 }
 0x423   : > { %1220 = dma.done.wait (%p1088_p12), %s993_s12, 256  }
 0x424   : > { %1222 = vsyncadd (%p1088_p12), %s993_s12, 4294967040  ;;  %p17_p13 = scmp.ge.s32.totalorder %s1312_s27, 4   ;;  %s1639_s21 = smov %s1229_s22 }
 0x425   : > { %s1640_s22 = smov %s1233_s23  ;;  %s1641_s23 = smov %s1323_s30 }
 0x426   : > { %s1642_s24 = smov %s1312_s27  ;;  %19 = sbr.rel (!%p17_p13) target bundleno = 4 (0x4), region = 84 }
 0x42b   :  { %998 = vsyncpa [#allocation5], 1 }
 0x42c   :  { %1000 = vsyncpa [#allocation5 + $0x1], 1 }
 0x42d   :  { %1001 = vsyncpa [#allocation6], 1 }
 0x42e   :  { %1003 = vsyncpa [#allocation6 + $0x1], 1 }

</bundles_post_ra>
